<compile_context>
chip_gen: v5e
topology: v5e:2x2
jax: 0.10.0
libtpu: 0.0.40
codegen_flags: <defaults>
</compile_context>

<pallas_src>
import jax
import jax.numpy as jnp
from jax import lax
from jax.experimental import pallas as pl
from jax.experimental.pallas import tpu as pltpu

BN_EPS = 1e-5


def dbn_tanh_kernel(x_ref, w_ref, b_ref, gamma_ref, beta_ref, o_ref):
    B, tS, Din = x_ref.shape
    Dout = w_ref.shape[0]

    # ---- Linear (MXU): (B*tS, Din) contracted with W (Dout, Din) -----------
    x2 = x_ref[...].reshape(B * tS, Din)
    y2 = lax.dot_general(
        x2, w_ref[...],
        dimension_numbers=(((1,), (1,)), ((), ())),   # contract both last dims
        preferred_element_type=jnp.float32,
    )
    y2 = y2 + b_ref[...]                              # (B*tS, Dout) + (1, Dout)
    y = y2.reshape(B, tS, Dout)

    # ---- BatchNorm1d over channel=seq axis (training-mode batch stats) -----
    mean = jnp.mean(y, axis=(0, 2), keepdims=True)        # (1, tS, 1)
    d = y - mean                                          # centered, reused
    var = jnp.mean(d * d, axis=(0, 2), keepdims=True)     # biased variance
    scale = gamma_ref[...] * lax.rsqrt(var + BN_EPS)      # (1, tS, 1)

    # ---- Folded affine + Tanh (EUP) -----------------------------------------
    o_ref[...] = jnp.tanh(d * scale + beta_ref[...]).astype(o_ref.dtype)


def _pick_seq_tile(B, S, Din, Dout, budget_bytes=8 * 1024 * 1024):
    """Largest seq tile that (a) divides S, (b) respects the (8,128) block rule
    on the seq axis (multiple of 8, or the full S), and (c) keeps the
    double-buffered x/out tiles plus f32 temporaries within a VMEM budget
    chosen to be safe even on v7x (64 MiB physical VMEM)."""
    per_s = 4 * B * (2 * Din + 4 * Dout)        # rough f32 bytes per seq position
    cap = max(1, budget_bytes // max(per_s, 1))
    candidates = [t for t in range(1, S + 1)
                  if S % t == 0 and (t == S or t % 8 == 0)]
    fitting = [t for t in candidates if t <= cap]
    return max(fitting) if fitting else min(candidates)


def dbn_tanh(x, w, b, gamma, beta):
    """x: (B, S, Din); w: (Dout, Din); b: (Dout,); gamma/beta: (S,)."""
    B, S, Din = x.shape
    Dout = w.shape[0]
    tS = _pick_seq_tile(B, S, Din, Dout)
    assert S % tS == 0

    b2 = b.reshape(1, Dout)
    g3 = gamma.reshape(1, S, 1)
    be3 = beta.reshape(1, S, 1)

    vmem = pltpu.MemorySpace.VMEM
    grid = (S // tS,)

    return pl.pallas_call(
        dbn_tanh_kernel,
        out_shape=jax.ShapeDtypeStruct((B, S, Dout), x.dtype),
        grid_spec=pltpu.PrefetchScalarGridSpec(
            num_scalar_prefetch=0,
            grid=grid,
            in_specs=[
                pl.BlockSpec((B, tS, Din), lambda s: (0, s, 0), memory_space=vmem),
                pl.BlockSpec((Dout, Din), lambda s: (0, 0), memory_space=vmem),
                pl.BlockSpec((1, Dout), lambda s: (0, 0), memory_space=vmem),
                pl.BlockSpec((1, tS, 1), lambda s: (0, s, 0), memory_space=vmem),
                pl.BlockSpec((1, tS, 1), lambda s: (0, s, 0), memory_space=vmem),
            ],
            out_specs=pl.BlockSpec((B, tS, Dout), lambda s: (0, s, 0),
                                   memory_space=vmem),
        ),
        compiler_params=pltpu.CompilerParams(
            dimension_semantics=("parallel",),   # seq tiles independent -> megacore
            vmem_limit_bytes=32 * 1024 * 1024,
        ),
    )(x, w, b2, g3, be3)


def dbn_tanh_reference(x, w, b, gamma, beta):
    """Pure-JAX reference (f32, HIGHEST precision matmul)."""
    y = jnp.einsum("bsi,oi->bso", x, w, precision=lax.Precision.HIGHEST) + b
    mean = jnp.mean(y, axis=(0, 2), keepdims=True)
    var = jnp.mean((y - mean) ** 2, axis=(0, 2), keepdims=True)
    y_hat = (y - mean) * lax.rsqrt(var + BN_EPS)
    y_bn = y_hat * gamma.reshape(1, -1, 1) + beta.reshape(1, -1, 1)
    return jnp.tanh(y_bn)


if __name__ == "__main__":
    # Small shapes consistent with the module: batch=2, seq_len=8,
    # input_size=32, output_size=32.
    B, S, Din, Dout = 2, 8, 32, 32

    key = jax.random.PRNGKey(0)
    kx, kw, kb = jax.random.split(key, 3)

    x = jax.random.normal(kx, (B, S, Din), dtype=jnp.float32)

    # PyTorch Linear default init: U(-1/sqrt(Din), 1/sqrt(Din))
    bound = 1.0 / (Din ** 0.5)
    w = jax.random.uniform(kw, (Dout, Din), minval=-bound, maxval=bound,
                           dtype=jnp.float32)
    b = jax.random.uniform(kb, (Dout,), minval=-bound, maxval=bound,
                           dtype=jnp.float32)
    # BatchNorm1d default affine init: weight=1, bias=0
    gamma = jnp.ones((S,), dtype=jnp.float32)
    beta = jnp.zeros((S,), dtype=jnp.float32)

    out = dbn_tanh(x, w, b, gamma, beta)
    out = jax.block_until_ready(out)
    assert out.shape == (B, S, Dout)

    ref = jax.block_until_ready(dbn_tanh_reference(x, w, b, gamma, beta))
    assert jnp.allclose(out, ref, rtol=1e-3, atol=1e-3), "kernel mismatch vs reference"

    print("KERNEL_OK")
</pallas_src>

<mosaic_0001>
module attributes {stable_mosaic.version = 11 : i64} {
  func.func @dbn_tanh_kernel(%arg0: i32, %arg1: memref<2x8x32xf32, #tpu.memory_space<vmem>>, %arg2: memref<32x32xf32, #tpu.memory_space<vmem>>, %arg3: memref<1x32xf32, #tpu.memory_space<vmem>>, %arg4: memref<1x8x1xf32, #tpu.memory_space<vmem>>, %arg5: memref<1x8x1xf32, #tpu.memory_space<vmem>>, %arg6: memref<2x8x32xf32, #tpu.memory_space<vmem>>) attributes {dimension_semantics = [#tpu.dimension_semantics<parallel>], iteration_bounds = array<i64: 1>, scalar_prefetch = 0 : i64, scratch_operands = 0 : i64, tpu.core_type = #tpu.core_type<tc>, window_params = [{transform_indices = @transform_0, window_bounds = array<i64: 2, 8, 32>}, {pipeline_mode = #tpu.pipeline_mode<synchronous>, transform_indices = @transform_1, window_bounds = array<i64: 32, 32>}, {pipeline_mode = #tpu.pipeline_mode<synchronous>, transform_indices = @transform_2, window_bounds = array<i64: 1, 32>}, {transform_indices = @transform_3, window_bounds = array<i64: 1, 8, 1>}, {transform_indices = @transform_4, window_bounds = array<i64: 1, 8, 1>}, {transform_indices = @transform_5, window_bounds = array<i64: 2, 8, 32>}]} {
    %c0 = arith.constant 0 : index
    %c0_0 = arith.constant 0 : index
    %c0_1 = arith.constant 0 : index
    %0 = vector.load %arg1[%c0, %c0_0, %c0_1] : memref<2x8x32xf32, #tpu.memory_space<vmem>>, vector<2x8x32xf32>
    %1 = vector.shape_cast %0 : vector<2x8x32xf32> to vector<16x32xf32>
    %c0_2 = arith.constant 0 : index
    %c0_3 = arith.constant 0 : index
    %2 = vector.load %arg2[%c0_2, %c0_3] : memref<32x32xf32, #tpu.memory_space<vmem>>, vector<32x32xf32>
    %cst = arith.constant dense<0.000000e+00> : vector<16x32xf32>
    %3 = tpu.matmul %1, %2, %cst {dimension_numbers = #tpu.dot_dimension_numbers<[1], [1], [0], [0], [0, 0, 1, 0], [], []>} : vector<16x32xf32>, vector<32x32xf32>, vector<16x32xf32> -> vector<16x32xf32>
    %c0_4 = arith.constant 0 : index
    %c0_5 = arith.constant 0 : index
    %4 = vector.load %arg3[%c0_4, %c0_5] : memref<1x32xf32, #tpu.memory_space<vmem>>, vector<1x32xf32>
    %5 = vector.broadcast %4 : vector<1x32xf32> to vector<16x32xf32>
    %6 = arith.addf %3, %5 : vector<16x32xf32>
    %7 = vector.shape_cast %6 : vector<16x32xf32> to vector<2x8x32xf32>
    %cst_6 = arith.constant dense<0.000000e+00> : vector<8xf32>
    %8 = vector.multi_reduction <add>, %7, %cst_6 [0, 2] : vector<2x8x32xf32> to vector<8xf32>
    %9 = vector.shape_cast %8 : vector<8xf32> to vector<1x8x1xf32>
    %cst_7 = arith.constant 6.400000e+01 : f32
    %10 = vector.broadcast %cst_7 : f32 to vector<1x8x1xf32>
    %11 = arith.divf %9, %10 : vector<1x8x1xf32>
    %12 = vector.broadcast %11 : vector<1x8x1xf32> to vector<2x8x32xf32>
    %13 = arith.subf %7, %12 : vector<2x8x32xf32>
    %14 = arith.mulf %13, %13 : vector<2x8x32xf32>
    %cst_8 = arith.constant dense<0.000000e+00> : vector<8xf32>
    %15 = vector.multi_reduction <add>, %14, %cst_8 [0, 2] : vector<2x8x32xf32> to vector<8xf32>
    %16 = vector.shape_cast %15 : vector<8xf32> to vector<1x8x1xf32>
    %cst_9 = arith.constant 6.400000e+01 : f32
    %17 = vector.broadcast %cst_9 : f32 to vector<1x8x1xf32>
    %18 = arith.divf %16, %17 : vector<1x8x1xf32>
    %c0_10 = arith.constant 0 : index
    %c0_11 = arith.constant 0 : index
    %c0_12 = arith.constant 0 : index
    %19 = vector.load %arg4[%c0_10, %c0_11, %c0_12] : memref<1x8x1xf32, #tpu.memory_space<vmem>>, vector<1x8x1xf32>
    %cst_13 = arith.constant 9.99999974E-6 : f32
    %20 = vector.broadcast %cst_13 : f32 to vector<1x8x1xf32>
    %21 = arith.addf %18, %20 : vector<1x8x1xf32>
    %22 = math.rsqrt %21 : vector<1x8x1xf32>
    %23 = arith.mulf %19, %22 : vector<1x8x1xf32>
    %24 = vector.broadcast %23 : vector<1x8x1xf32> to vector<2x8x32xf32>
    %25 = arith.mulf %13, %24 : vector<2x8x32xf32>
    %c0_14 = arith.constant 0 : index
    %c0_15 = arith.constant 0 : index
    %c0_16 = arith.constant 0 : index
    %26 = vector.load %arg5[%c0_14, %c0_15, %c0_16] : memref<1x8x1xf32, #tpu.memory_space<vmem>>, vector<1x8x1xf32>
    %27 = vector.broadcast %26 : vector<1x8x1xf32> to vector<2x8x32xf32>
    %28 = arith.addf %25, %27 : vector<2x8x32xf32>
    %29 = math.tanh %28 : vector<2x8x32xf32>
    %c0_17 = arith.constant 0 : index
    %c0_18 = arith.constant 0 : index
    %c0_19 = arith.constant 0 : index
    %30 = vector.load %arg6[%c0_17, %c0_18, %c0_19] : memref<2x8x32xf32, #tpu.memory_space<vmem>>, vector<2x8x32xf32>
    tpu.vector_store %arg6[%c0_17, %c0_18, %c0_19], %29 {strides = array<i32>} : memref<2x8x32xf32, #tpu.memory_space<vmem>>, vector<2x8x32xf32>,
    return
  }
  func.func @transform_0(%arg0: i32) -> (i32, i32, i32) {
    %c0_i32 = arith.constant 0 : i32
    %c0_i32_0 = arith.constant 0 : i32
    %c0_i32_1 = arith.constant 0 : i32
    return %c0_i32, %arg0, %c0_i32_0 : i32, i32, i32
  }
  func.func @transform_1(%arg0: i32) -> (i32, i32) {
    %c0_i32 = arith.constant 0 : i32
    %c0_i32_0 = arith.constant 0 : i32
    %c0_i32_1 = arith.constant 0 : i32
    return %c0_i32, %c0_i32_0 : i32, i32
  }
  func.func @transform_2(%arg0: i32) -> (i32, i32) {
    %c0_i32 = arith.constant 0 : i32
    %c0_i32_0 = arith.constant 0 : i32
    %c0_i32_1 = arith.constant 0 : i32
    return %c0_i32, %c0_i32_0 : i32, i32
  }
  func.func @transform_3(%arg0: i32) -> (i32, i32, i32) {
    %c0_i32 = arith.constant 0 : i32
    %c0_i32_0 = arith.constant 0 : i32
    %c0_i32_1 = arith.constant 0 : i32
    return %c0_i32, %arg0, %c0_i32_0 : i32, i32, i32
  }
  func.func @transform_4(%arg0: i32) -> (i32, i32, i32) {
    %c0_i32 = arith.constant 0 : i32
    %c0_i32_0 = arith.constant 0 : i32
    %c0_i32_1 = arith.constant 0 : i32
    return %c0_i32, %arg0, %c0_i32_0 : i32, i32, i32
  }
  func.func @transform_5(%arg0: i32) -> (i32, i32, i32) {
    %c0_i32 = arith.constant 0 : i32
    %c0_i32_0 = arith.constant 0 : i32
    %c0_i32_1 = arith.constant 0 : i32
    return %c0_i32, %arg0, %c0_i32_0 : i32, i32, i32
  }
}

</mosaic_0001>

<bundles_post_ra>
// kernel: tpu_custom_call.1
= control target key start
LH: loop header
LB: loop body
LE: loop exit
PB: predicated region body
PF: predicated region fallthrough
CT: control target
= control target key end

     0   :  { %10 = vsyncpa [#allocation3], 0  ;;  %s321_s0 = inlined_call_operand.vmem [shape: f32[2,8,32], index: 0, kind: input, shape index: {}]   ;;  %s322_s1 = inlined_call_operand.hbm [shape: f32[32,32], index: 1, kind: input, shape index: {}]   ;;  %s323_s2 = inlined_call_operand.vmem [shape: f32[1,32], index: 2, kind: input, shape index: {}]   ;;  %s324_s3 = inlined_call_operand.vmem [shape: f32[1,8,1], index: 3, kind: input, shape index: {}]   ;;  %s325_s4 = inlined_call_operand.vmem [shape: f32[1,8,1], index: 4, kind: input, shape index: {}]   ;;  %s326_s5 = inlined_call_operand.hbm [shape: f32[2,8,32], index: 5, kind: output, shape index: {}]  }
   0x1   :  { %11 = vsyncpa [#allocation4], 0  ;;  %s18_s20 = sshll.u32 %s322_s1, 4  ;;  %s242_s21 = smov [#allocation2]   ;;  %s19_s20 = int_to_ptr.hbm [resolvable:$true] %s18_s20 }
   0x2   :  { %s20_s22 = sshll.u32 %s242_s21, 4  ;;  %s243_s23 = smov 128   ;;  %s21_s22 = int_to_ptr.vmem [resolvable:$true] %s20_s22 }
   0x3   :  { %s244_s24 = smov 8  }
   0x4   :  { %26 = dma.hbm_to_vmem [thread:$0]  %s19_s20, 512, %s21_s22, [#allocation3], %s243_s23, %s243_s23, %s244_s24  }
   0x5   :  { %238 = dma.done.wait [#allocation3], 512  }
   0x6   :  { %239 = vsyncadd [#allocation3], 4294966784  ;;  %vm47_vm0 = vcmask 261120   ;;  %v42_v0 = vld [vmem:[#allocation2 + $0x18] sm:$0xff]  ;;  %v41_v1 = vld [vmem:[#allocation2 + $0x10] sm:$0xff]  ;;  %v245_v14 = vmov 64.0  }
   0x7   :  { %163 = vmatpush.xpose.msk.msra.mxu0 %vm47_vm0, %v42_v0  ;;  %169 = vmatpush.xpose.msk.msra.mxu1 %vm47_vm0, %v42_v0  ;;  %v40_v2 = vld [vmem:[#allocation2 + $0x8] sm:$0xff]  ;;  %v39_v3 = vld [vmem:[#allocation2] sm:$0xff]  ;;  %182 = vrcp.f32 %v245_v14  ;;  %v246_v30 = vmov 0   ;;  %s247_s7 = smov [#allocation5]   ;;  %s150_s10 = sshll.u32 %s326_s5, 4  ;;  %s151_s10 = int_to_ptr.hbm [resolvable:$true] %s150_s10 }
   0x8   :  { %v37_v4 = vld [vmem:[%s321_s0] sm:$0xff]  ;;  %v38_v5 = vld [vmem:[%s321_s0 + $0x8] sm:$0xff]  ;;  %179 = vset.pattern.permute.xlu1 %v246_v30  ;;  %180 = vset.pattern.permute.xlu0 %v246_v30 }
   0x9   :  { %v181_v6 = vld [vmem:[%s323_s2] ss:$0 sm:$0xff] }
   0xa   :  { %v112_v39 = vld [vmem:[%s324_s3] sm:$0xff]  ;;  %s148_s3 = sshll.u32 %s247_s7, 4  ;;  %s149_s3 = int_to_ptr.vmem [resolvable:$true] %s148_s3 }
   0xb   :  { %164 = vmatpush.xpose.msk.msra.mxu0 %vm47_vm0, %v41_v1  ;;  %170 = vmatpush.xpose.msk.msra.mxu1 %vm47_vm0, %v41_v1  ;;  %v132_v43 = vld [vmem:[%s325_s4] sm:$0xff] }
   0xd   :  { %v183_v15 = vpop.eup %182 }
   0xe   :  { %v95_v16 = vmul.f32 64.0, %v183_v15  ;;  %vm99_vm1 = vweird.f32 %v183_v15 }
   0xf   :  { %165 = vmatpush.xpose.msk.msra.mxu0 %vm47_vm0, %v40_v2  ;;  %171 = vmatpush.xpose.msk.msra.mxu1 %vm47_vm0, %v40_v2 }
  0x10   :  { %v96_v17 = vsub.f32 1.0, %v95_v16 }
  0x12   :  { %v97_v18 = vmul.f32 %v183_v15, %v96_v17 }
  0x13   :  { %166 = vmatpush.xpose.msk.msra.mxu0 %vm47_vm0, %v39_v3  ;;  %172 = vmatpush.xpose.msk.msra.mxu1 %vm47_vm0, %v39_v3 }
  0x14   :  { %v98_v19 = vadd.f32 %v183_v15, %v97_v18 }
  0x16   :  { %167 = vmatmul.msk.f32.vlgmr.msra.gmra.mxu0 %vm47_vm0, %v37_v4  ;;  %168 = vmatmul.msk.f32.vlgmr.msra.gmra.mxu1 %vm47_vm0, %v38_v5  ;;  %v100_v20 = vsel %vm99_vm1, %v183_v15, %v98_v19 }
  0x93   :  { %v83_v7 = vpop.f32.mrf.mxu0  ;;  %v86_v8 = vpop.f32.mrf.mxu1 }
  0x94   :  { %v84_v9 = vadd.f32 %v181_v6, %v83_v7  ;;  %v87_v10 = vadd.f32 %v181_v6, %v86_v8 }
  0x96   :  { %v89_v11 = vsel %vm47_vm0, %v84_v9, 0.0  ;;  %v90_v12 = vsel %vm47_vm0, %v87_v10, 0.0 }
  0x97   :  { %v91_v13 = vadd.f32 %v90_v12, %v89_v11 }
  0x99   :  { %92 = vadd.xlane.f32.xlu0 %v91_v13 }
 0x10c   :  { %v93_v21 = vpop.xlane.xlu0 %92 }
 0x10d   :  { %v101_v22 = vmul.f32 %v100_v20, %v93_v21 }
 0x10f   :  { %v102_v23 = vsub.f32 %v84_v9, %v101_v22  ;;  %v103_v24 = vsub.f32 %v87_v10, %v101_v22 }
 0x111   :  { %v104_v25 = vmul.f32 %v102_v23, %v102_v23  ;;  %v105_v26 = vmul.f32 %v103_v24, %v103_v24 }
 0x113   :  { %v106_v27 = vsel %vm47_vm0, %v104_v25, 0.0  ;;  %v107_v28 = vsel %vm47_vm0, %v105_v26, 0.0 }
 0x114   :  { %v108_v29 = vadd.f32 %v107_v28, %v106_v27 }
 0x116   :  { %109 = vadd.xlane.f32.xlu0 %v108_v29 }
 0x189   :  { %v110_v31 = vpop.xlane.xlu0 %109 }
 0x18a   :  { %v111_v32 = vmul.f32 %v110_v31, %v100_v20 }
 0x18c   :  { %v113_v33 = vadd.f32 1e-05, %v111_v32 }
 0x18e   :  { %184 = vrsqrt.f32 %v113_v33  ;;  %vm120_vm3 = vweird.f32 %v113_v33 }
 0x194   :  { %v185_v34 = vpop.eup %184 }
 0x195   :  { %v115_v35 = vmul.f32 %v185_v34, %v113_v33  ;;  %vm121_vm2 = vweird.f32 %v185_v34 }
 0x196   :  { %vm122_vm4 = vmor %vm120_vm3, %vm121_vm2 }
 0x197   :  { %v116_v36 = vmul.f32 %v185_v34, %v115_v35 }
 0x199   :  { %v117_v37 = vmul.f32 0.5, %v116_v36 }
 0x19b   :  { %v118_v38 = vsub.f32 1.5, %v117_v37 }
 0x19d   :  { %v119_v40 = vmul.f32 %v185_v34, %v118_v38 }
 0x19f   :  { %v123_v41 = vsel %vm122_vm4, %v185_v34, %v119_v40 }
 0x1a0   :  { %v124_v42 = vmul.f32 %v123_v41, %v112_v39 }
 0x1a2   :  { %127 = vperm.xlu1 %179, %v124_v42  }
 0x1aa   :  { %135 = vperm.xlu1 %179, %v132_v43  }
 0x214   :  { %v128_v44 = vpop.permute.xlu1 %127 }
 0x215   :  { %v130_v45 = vmul.f32 %v128_v44, %v102_v23  ;;  %v131_v46 = vmul.f32 %v128_v44, %v103_v24 }
 0x21c   :  { %v136_v47 = vpop.permute.xlu1 %135 }
 0x21d   :  { %v138_v48 = vadd.f32 %v136_v47, %v130_v45  ;;  %v139_v49 = vadd.f32 %v136_v47, %v131_v46 }
 0x21f   :  { %186 = vtanh.f32 %v138_v48 }
 0x220   :  { %188 = vtanh.f32 %v139_v49 }
 0x225   :  { %v187_v50 = vpop.eup %186 }
 0x226   :  { %v189_v51 = vpop.eup %188  ;;  %142 = vst.msk [vmem:[#allocation5] sm:$0xff] %vm47_vm0, %v187_v50 }
 0x227   :  { %143 = vst.msk [vmem:[#allocation5 + $0x8] sm:$0xff] %vm47_vm0, %v189_v51 }
 0x228   :  { %156 = dma.vmem_to_hbm [thread:$0]  %s149_s3, 256, %s151_s10, [#allocation4], %s243_s23, %s243_s23, %s244_s24  }
 0x229   :  { %240 = dma.done.wait [#allocation4], 256  }
 0x22a   :  { %241 = vsyncadd [#allocation4], 4294967040 }
 0x22b   :  { %161 = vsyncpa [#allocation3], 1 }
 0x22c   :  { %162 = vsyncpa [#allocation4], 1 }

</bundles_post_ra>
